<compile_context>
chip_gen: v5e
topology: v5e:2x2
jax: 0.10.0
libtpu: 0.0.40
codegen_flags: <defaults>
</compile_context>

<pallas_src>
import functools
import math

import jax
import jax.numpy as jnp
from jax.experimental import pallas as pl
from jax.experimental.pallas import tpu as pltpu


LANE = 128     # TPU lane width: pad out_channels to a multiple of this.
TILE_M = 512   # row tile for the 1x1 conv (v7x-VMEM-safe, >=512 for HBM roofline)
TR = 8         # output-row tile for the 3x3 conv


def _round_up(x, m):
    return ((x + m - 1) // m) * m


# ----------------------------------------------------------------------------
# Pallas kernels
# ----------------------------------------------------------------------------
def _conv1x1_kernel(x_ref, w_ref, b_ref, o_ref):
    # x: [TM, Cin], w: [Cin, Cout], b: [1, Cout] -> o: [TM, Cout]
    o_ref[...] = (
        jnp.dot(x_ref[...], w_ref[...], preferred_element_type=jnp.float32)
        + b_ref[...]
    )


def _conv1x1_skip_kernel(x_ref, skip_ref, w_ref, b_ref, o_ref):
    # Fused lateral conv + top-down (upsampled) skip add.
    o_ref[...] = (
        jnp.dot(x_ref[...], w_ref[...], preferred_element_type=jnp.float32)
        + b_ref[...]
        + skip_ref[...]
    )


def _conv3x3_kernel(xp_ref, w_ref, b_ref, o_ref, xbuf, sem, *, tr, wp):
    # xp_ref: HBM [N, (H_pad+2)*wp, C]  (spatially padded, rows flattened, wp=W+2)
    # w_ref : VMEM [9, C, C]   (tap-major weights)
    # b_ref : VMEM [1, C]
    # o_ref : VMEM block [tr*wp, C]  (output at padded width; cols W..W+1 junk)
    # xbuf  : VMEM scratch [2, (tr+2)*wp + 8, C]  (double-buffered halo blocks)
    # sem   : DMA semaphores [2]
    n = pl.program_id(0)
    r = pl.program_id(1)
    n_rb = pl.num_programs(1)

    m = tr * wp                 # flat output rows produced by this block
    halo = (tr + 2) * wp        # flat input rows needed (incl. 1-row halo)
    slot = r % 2

    def issue(rb, slt):
        start = rb * m
        if (m % 8) == 0:
            start = pl.multiple_of(start, 8)
        pltpu.make_async_copy(
            xp_ref.at[n, pl.ds(start, halo)],
            xbuf.at[slt, pl.ds(0, halo)],
            sem.at[slt],
        ).start()

    # Prime the pipeline at the start of each image (row axis is "arbitrary",
    # so the per-image chain never splits across cores).
    @pl.when(r == 0)
    def _():
        issue(0, 0)

    # Prefetch the next row block of the same image into the other slot.
    @pl.when(r + 1 < n_rb)
    def _():
        issue(r + 1, 1 - slot)

    # Wait for the current slot's DMA (descriptor shape must match the start).
    pltpu.make_async_copy(
        xp_ref.at[n, pl.ds(0, halo)],
        xbuf.at[slot, pl.ds(0, halo)],
        sem.at[slot],
    ).wait()

    # 9 shifted channel matmuls accumulated straight into the output VMEM block.
    # A tap (dy, dx) is just a flat row offset dy*wp + dx; the (at most 2)
    # stale trailing rows of the slot only ever feed the discarded padded cols.
    for dy in range(3):
        for dx in range(3):
            off = dy * wp + dx
            contrib = jnp.dot(
                xbuf[slot, pl.ds(off, m), :],
                w_ref[dy * 3 + dx],
                preferred_element_type=jnp.float32,
            )
            if dy == 0 and dx == 0:
                o_ref[...] = contrib + b_ref[...]   # init with bias
            else:
                o_ref[...] += contrib


_VMEM_SPEC = pl.BlockSpec(memory_space=pltpu.MemorySpace.VMEM)


# ----------------------------------------------------------------------------
# Wrappers (glue: layout, padding, pallas_call setup)
# ----------------------------------------------------------------------------
def lateral_conv1x1(x_nhwc, w, b, skip_nhwc=None):
    """1x1 conv (+ optional fused skip add).  x: [N,H,W,Cin], w: [Cin,Cpad]."""
    N, H, W, Cin = x_nhwc.shape
    Cout = w.shape[1]
    M = N * H * W
    tm = M if M <= TILE_M else TILE_M
    grid = (pl.cdiv(M, tm),)

    xm = x_nhwc.reshape(M, Cin)
    x_spec = pl.BlockSpec((tm, Cin), lambda i: (i, 0))
    o_spec = pl.BlockSpec((tm, Cout), lambda i: (i, 0))
    cparams = pltpu.CompilerParams(dimension_semantics=("parallel",))

    if skip_nhwc is None:
        out = pl.pallas_call(
            _conv1x1_kernel,
            out_shape=jax.ShapeDtypeStruct((M, Cout), jnp.float32),
            grid=grid,
            in_specs=[x_spec, _VMEM_SPEC, _VMEM_SPEC],
            out_specs=o_spec,
            compiler_params=cparams,
        )(xm, w, b)
    else:
        skip_m = skip_nhwc.reshape(M, Cout)
        s_spec = pl.BlockSpec((tm, Cout), lambda i: (i, 0))
        out = pl.pallas_call(
            _conv1x1_skip_kernel,
            out_shape=jax.ShapeDtypeStruct((M, Cout), jnp.float32),
            grid=grid,
            in_specs=[x_spec, s_spec, _VMEM_SPEC, _VMEM_SPEC],
            out_specs=o_spec,
            compiler_params=cparams,
        )(xm, skip_m, w, b)
    return out.reshape(N, H, W, Cout)


def conv3x3_p1(lat_nhwc, w9, b):
    """3x3 conv, stride 1, padding 1.  lat: [N,H,W,C], w9: [9,C,C], b: [1,C]."""
    N, H, W, C = lat_nhwc.shape
    tr = min(TR, H)                    # don't over-pad tiny top levels
    h_pad = _round_up(H, tr)           # make the row grid divide evenly
    wp = W + 2

    # Spatial zero pad (1 left/right, 1 top, 1 + grid-rounding bottom), then
    # flatten the spatial dims so a tap shift is a pure flat row offset.
    xp = jnp.pad(lat_nhwc, ((0, 0), (1, h_pad - H + 1), (1, 1), (0, 0)))
    xp = xp.reshape(N, (h_pad + 2) * wp, C)

    n_rb = h_pad // tr
    out = pl.pallas_call(
        functools.partial(_conv3x3_kernel, tr=tr, wp=wp),
        out_shape=jax.ShapeDtypeStruct((N, h_pad * wp, C), jnp.float32),
        grid=(N, n_rb),
        in_specs=[
            pl.BlockSpec(memory_space=pl.ANY),   # padded input stays in HBM
            _VMEM_SPEC,                          # weights resident in VMEM
            _VMEM_SPEC,                          # bias resident in VMEM
        ],
        out_specs=pl.BlockSpec((None, tr * wp, C), lambda n, r: (n, r, 0)),
        scratch_shapes=[
            pltpu.VMEM((2, (tr + 2) * wp + 8, C), jnp.float32),
            pltpu.SemaphoreType.DMA((2,)),
        ],
        compiler_params=pltpu.CompilerParams(
            dimension_semantics=("parallel", "arbitrary")),
    )(xp, w9, b)

    # Drop the 2 junk columns and the grid-rounding rows; keep channel padding.
    return out.reshape(N, h_pad, wp, C)[:, :H, :W, :]


def nearest_upsample(x_nhwc, out_h, out_w):
    """PyTorch F.interpolate(mode='nearest'): src = floor(dst * in / out)."""
    N, H, W, C = x_nhwc.shape
    hi = (jnp.arange(out_h) * H) // out_h
    wi = (jnp.arange(out_w) * W) // out_w
    return x_nhwc[:, hi][:, :, wi]


# ----------------------------------------------------------------------------
# FPN parameters + forward
# ----------------------------------------------------------------------------
def init_fpn_params(key, in_channels_list, out_channels):
    cpad = _round_up(out_channels, LANE)
    params = []
    for cin in in_channels_list:
        key, k_lat, k_fpn = jax.random.split(key, 3)
        # lateral 1x1: kaiming_normal fan_out = out_channels * 1 * 1
        std_lat = math.sqrt(2.0 / (out_channels * 1 * 1))
        w_lat = std_lat * jax.random.normal(k_lat, (cin, out_channels), jnp.float32)
        w_lat = jnp.pad(w_lat, ((0, 0), (0, cpad - out_channels)))
        b_lat = jnp.zeros((1, cpad), jnp.float32)
        # fpn 3x3: kaiming_normal fan_out = out_channels * 3 * 3
        std_fpn = math.sqrt(2.0 / (out_channels * 3 * 3))
        w_fpn = std_fpn * jax.random.normal(
            k_fpn, (9, out_channels, out_channels), jnp.float32)
        w_fpn = jnp.pad(
            w_fpn, ((0, 0), (0, cpad - out_channels), (0, cpad - out_channels)))
        b_fpn = jnp.zeros((1, cpad), jnp.float32)
        params.append(dict(w_lat=w_lat, b_lat=b_lat, w_fpn=w_fpn, b_fpn=b_fpn))
    return params


def fpn_forward(params, inputs_nchw, out_channels):
    """inputs_nchw: list of [N, Cin_i, H_i, W_i] tensors (PyTorch layout)."""
    inputs = [jnp.transpose(x, (0, 2, 3, 1)) for x in inputs_nchw]  # -> NHWC
    L = len(inputs)

    # Top-down pathway with the upsample-add fused into the lateral 1x1 conv.
    laterals = [None] * L
    laterals[L - 1] = lateral_conv1x1(
        inputs[L - 1], params[L - 1]["w_lat"], params[L - 1]["b_lat"])
    for i in range(L - 2, -1, -1):
        th, tw = inputs[i].shape[1], inputs[i].shape[2]
        skip = nearest_upsample(laterals[i + 1], th, tw)
        laterals[i] = lateral_conv1x1(
            inputs[i], params[i]["w_lat"], params[i]["b_lat"], skip_nhwc=skip)

    # Output 3x3 convs.
    outs = [
        conv3x3_p1(laterals[i], params[i]["w_fpn"], params[i]["b_fpn"])
        for i in range(L)
    ]

    # Strip channel padding, NHWC -> NCHW to match PyTorch output layout.
    outs = [o[..., :out_channels] for o in outs]
    return [jnp.transpose(o, (0, 3, 1, 2)) for o in outs]


# ----------------------------------------------------------------------------
# Pure-JAX reference (mirrors the PyTorch module) for correctness checking
# ----------------------------------------------------------------------------
def _ref_conv(x_nchw, w_oihw, b, padding):
    y = jax.lax.conv_general_dilated(
        x_nchw, w_oihw, window_strides=(1, 1), padding=padding,
        dimension_numbers=("NCHW", "OIHW", "NCHW"),
        precision=jax.lax.Precision.HIGHEST)
    return y + b.reshape(1, -1, 1, 1)


def ref_fpn_forward(params, inputs_nchw, out_channels):
    L = len(inputs_nchw)
    laterals = []
    for i in range(L):
        w = params[i]["w_lat"][:, :out_channels]              # [Cin, Cout]
        w_oihw = jnp.transpose(w, (1, 0))[:, :, None, None]   # [Cout, Cin, 1, 1]
        b = params[i]["b_lat"][0, :out_channels]
        laterals.append(_ref_conv(inputs_nchw[i], w_oihw, b, "VALID"))
    for i in range(L - 1, 0, -1):
        th, tw = laterals[i - 1].shape[2:]
        H, W = laterals[i].shape[2:]
        hi = (jnp.arange(th) * H) // th
        wi = (jnp.arange(tw) * W) // tw
        up = laterals[i][:, :, hi][:, :, :, wi]
        laterals[i - 1] = laterals[i - 1] + up
    outs = []
    for i in range(L):
        w9 = params[i]["w_fpn"][:, :out_channels, :out_channels]  # [9, Cin, Cout]
        w_oihw = jnp.transpose(
            w9.reshape(3, 3, out_channels, out_channels), (3, 2, 0, 1))
        b = params[i]["b_fpn"][0, :out_channels]
        outs.append(_ref_conv(laterals[i], w_oihw, b, ((1, 1), (1, 1))))
    return outs


# ----------------------------------------------------------------------------
if __name__ == "__main__":
    key = jax.random.PRNGKey(0)

    # Small pyramid: 3 levels, batch=2.
    in_channels_list = [4, 8, 16]
    out_channels = 8
    spatial = [16, 8, 4]
    batch = 2

    k_params, *k_inputs = jax.random.split(key, 1 + len(in_channels_list))
    params = init_fpn_params(k_params, in_channels_list, out_channels)

    inputs = [
        jax.random.normal(
            k_inputs[i],
            (batch, in_channels_list[i], spatial[i], spatial[i]),
            jnp.float32)
        for i in range(len(in_channels_list))
    ]

    outs = jax.block_until_ready(fpn_forward(params, inputs, out_channels))

    # Shape check: PyTorch FPN outputs are [N, out_channels, H_i, W_i].
    for i, o in enumerate(outs):
        assert o.shape == (batch, out_channels, spatial[i], spatial[i]), o.shape

    # Numerical check against a pure-JAX reference of the PyTorch module.
    refs = jax.block_until_ready(ref_fpn_forward(params, inputs, out_channels))
    for o, r in zip(outs, refs):
        err = float(jnp.max(jnp.abs(o - r)))
        assert jnp.allclose(o, r, rtol=2e-2, atol=2e-2), err

    print("KERNEL_OK")
</pallas_src>

<mosaic_0001>
module attributes {stable_mosaic.version = 11 : i64} {
  func.func @_conv1x1_kernel(%arg0: i32, %arg1: memref<32x16xf32, #tpu.memory_space<vmem>>, %arg2: memref<16x128xf32, #tpu.memory_space<vmem>>, %arg3: memref<1x128xf32, #tpu.memory_space<vmem>>, %arg4: memref<32x128xf32, #tpu.memory_space<vmem>>) attributes {dimension_semantics = [#tpu.dimension_semantics<parallel>], iteration_bounds = array<i64: 1>, scalar_prefetch = 0 : i64, scratch_operands = 0 : i64, tpu.core_type = #tpu.core_type<tc>, window_params = [{transform_indices = @transform_0, window_bounds = array<i64: 32, 16>}, {pipeline_mode = #tpu.pipeline_mode<synchronous>, transform_indices = @transform_1, window_bounds = array<i64: 16, 128>}, {pipeline_mode = #tpu.pipeline_mode<synchronous>, transform_indices = @transform_2, window_bounds = array<i64: 1, 128>}, {transform_indices = @transform_3, window_bounds = array<i64: 32, 128>}]} {
    %c0 = arith.constant 0 : index
    %c0_0 = arith.constant 0 : index
    %0 = vector.load %arg1[%c0, %c0_0] : memref<32x16xf32, #tpu.memory_space<vmem>>, vector<32x16xf32>
    %c0_1 = arith.constant 0 : index
    %c0_2 = arith.constant 0 : index
    %1 = vector.load %arg2[%c0_1, %c0_2] : memref<16x128xf32, #tpu.memory_space<vmem>>, vector<16x128xf32>
    %cst = arith.constant dense<0.000000e+00> : vector<32x128xf32>
    %2 = tpu.matmul %0, %1, %cst {dimension_numbers = #tpu.dot_dimension_numbers<[1], [0], [0], [1], [0, 0, 1, 1], [], []>} : vector<32x16xf32>, vector<16x128xf32>, vector<32x128xf32> -> vector<32x128xf32>
    %c0_3 = arith.constant 0 : index
    %c0_4 = arith.constant 0 : index
    %3 = vector.load %arg3[%c0_3, %c0_4] : memref<1x128xf32, #tpu.memory_space<vmem>>, vector<1x128xf32>
    %4 = vector.broadcast %3 : vector<1x128xf32> to vector<32x128xf32>
    %5 = arith.addf %2, %4 : vector<32x128xf32>
    %c0_5 = arith.constant 0 : index
    %c0_6 = arith.constant 0 : index
    %6 = vector.load %arg4[%c0_5, %c0_6] : memref<32x128xf32, #tpu.memory_space<vmem>>, vector<32x128xf32>
    tpu.vector_store %arg4[%c0_5, %c0_6], %5 {strides = array<i32>} : memref<32x128xf32, #tpu.memory_space<vmem>>, vector<32x128xf32>,
    return
  }
  func.func @transform_0(%arg0: i32) -> (i32, i32) {
    %c0_i32 = arith.constant 0 : i32
    %c0_i32_0 = arith.constant 0 : i32
    return %arg0, %c0_i32 : i32, i32
  }
  func.func @transform_1(%arg0: i32) -> (i32, i32) {
    %c0_i32 = arith.constant 0 : i32
    %c0_i32_0 = arith.constant 0 : i32
    %c0_i32_1 = arith.constant 0 : i32
    return %c0_i32, %c0_i32_0 : i32, i32
  }
  func.func @transform_2(%arg0: i32) -> (i32, i32) {
    %c0_i32 = arith.constant 0 : i32
    %c0_i32_0 = arith.constant 0 : i32
    %c0_i32_1 = arith.constant 0 : i32
    return %c0_i32, %c0_i32_0 : i32, i32
  }
  func.func @transform_3(%arg0: i32) -> (i32, i32) {
    %c0_i32 = arith.constant 0 : i32
    %c0_i32_0 = arith.constant 0 : i32
    return %arg0, %c0_i32 : i32, i32
  }
}

</mosaic_0001>

<bundles_post_ra>
// kernel: tpu_custom_call.1
= control target key start
LH: loop header
LB: loop body
LE: loop exit
PB: predicated region body
PF: predicated region fallthrough
CT: control target
= control target key end

     0   :  { %vm25_vm0 = vcmask 130048   ;;  %s176_s0 = inlined_call_operand.vmem [shape: f32[32,16], index: 0, kind: input, shape index: {}]   ;;  %s177_s1 = inlined_call_operand.vmem [shape: f32[16,128], index: 1, kind: input, shape index: {}]   ;;  %s178_s2 = inlined_call_operand.vmem [shape: f32[1,128], index: 2, kind: input, shape index: {}]   ;;  %s179_s3 = inlined_call_operand.hbm [shape: f32[32,128], index: 3, kind: output, shape index: {}]  }
   0x1   :  { %v20_v0 = vld [vmem:[%s177_s1 + $0x8] sm:$0xff]  ;;  %v19_v1 = vld [vmem:[%s177_s1] sm:$0xff]  ;;  %v17_v2 = vld [vmem:[%s176_s0 + $0x10] sm:$0xff] }
   0x2   :  { %94 = vmatpush.msra.mxu2 %v20_v0  ;;  %95 = vmatpush.msra.mxu3 %v20_v0  ;;  %v18_v3 = vld [vmem:[%s176_s0 + $0x18] sm:$0xff] }
   0x3   :  { %52 = vmatpush.msra.mxu0 %v20_v0  ;;  %93 = vmatpush.msra.mxu1 %v20_v0 }
   0x4   :  { %8 = vsyncpa [#allocation3], 0  ;;  %97 = vmatpush.msra.mxu2 %v19_v1  ;;  %98 = vmatpush.msra.mxu3 %v19_v1  ;;  %v15_v4 = vld [vmem:[%s176_s0] sm:$0xff]  ;;  %v16_v5 = vld [vmem:[%s176_s0 + $0x8] sm:$0xff]  ;;  %s129_s25 = smov [#allocation2]   ;;  %s77_s0 = sshll.u32 %s179_s3, 4  ;;  %s78_s0 = int_to_ptr.hbm [resolvable:$true] %s77_s0 }
   0x5   :  { %91 = vmatmul.msk.f32.vlgmr.msra.gmra.mxu2 %vm25_vm0, %v17_v2  ;;  %92 = vmatmul.msk.f32.vlgmr.msra.gmra.mxu3 %vm25_vm0, %v18_v3  ;;  %v102_v6 = vld [vmem:[%s178_s2] ss:$0 sm:$0xff]  ;;  %s75_s26 = sshll.u32 %s129_s25, 4  ;;  %s130_s2 = smov 128   ;;  %s76_s26 = int_to_ptr.vmem [resolvable:$true] %s75_s26 }
   0x6   :  { %53 = vmatpush.msra.mxu0 %v19_v1  ;;  %96 = vmatpush.msra.mxu1 %v19_v1  ;;  %s131_s29 = smov 8  }
   0x7   :  { %89 = vmatmul.msk.f32.vlgmr.msra.gmra.mxu0 %vm25_vm0, %v15_v4  ;;  %90 = vmatmul.msk.f32.vlgmr.msra.gmra.mxu1 %vm25_vm0, %v16_v5 }
  0x84   :  { %v55_v7 = vpop.f32.mrf.mxu0  ;;  %v58_v8 = vpop.f32.mrf.mxu1 }
  0x85   :  { %v56_v9 = vadd.f32 %v102_v6, %v55_v7  ;;  %v59_v10 = vadd.f32 %v102_v6, %v58_v8 }
  0x87   :  { %67 = vst [vmem:[#allocation2] sm:$0xff] %v56_v9 }
  0x88   :  { %68 = vst [vmem:[#allocation2 + $0x8] sm:$0xff] %v59_v10  ;;  %v61_v11 = vpop.f32.mrf.mxu2  ;;  %v64_v12 = vpop.f32.mrf.mxu3 }
  0x89   :  { %v62_v13 = vadd.f32 %v102_v6, %v61_v11  ;;  %v65_v14 = vadd.f32 %v102_v6, %v64_v12 }
  0x8b   :  { %69 = vst [vmem:[#allocation2 + $0x10] sm:$0xff] %v62_v13 }
  0x8c   :  { %70 = vst [vmem:[#allocation2 + $0x18] sm:$0xff] %v65_v14 }
  0x8d   :  { %83 = dma.vmem_to_hbm [thread:$0]  %s76_s26, 512, %s78_s0, [#allocation3], %s130_s2, %s130_s2, %s131_s29  }
  0x8e   :  { %127 = dma.done.wait [#allocation3], 512  }
  0x8f   :  { %128 = vsyncadd [#allocation3], 4294966784 }
  0x90   :  { %88 = vsyncpa [#allocation3], 1 }

</bundles_post_ra>
